<compile_context>
chip_gen: v6e
topology: v6e:2x2x1
jax: 0.10.0
libtpu: 0.0.40
codegen_flags: <defaults>
</compile_context>

<pallas_src>
import functools

import jax
import jax.numpy as jnp
from jax import lax
from jax.experimental import pallas as pl
from jax.experimental.pallas import tpu as pltpu


def _round_up(x, m):
    return ((x + m - 1) // m) * m


def _chip_defaults():
    """(batch_chunk, class_block): 256 matches the 2x256x256 MXU on v6e/v7x,
    128 matches the 4x128x128 MXU on v4/v5."""
    try:
        kind = jax.devices()[0].device_kind.lower()
    except Exception:
        kind = ""
    if "v4" in kind or "v5" in kind:
        return 128, 128
    return 256, 256


def _embed_kernel(rows_ref, table_ref, out_ref, *, k_block):
    # rows_ref : (TB, 1)       int32  — labels after CFG drop, one batch chunk
    # table_ref: (C_pad, TH)   f32/bf16 — VMEM-resident table slab
    # out_ref  : (TB, TH)      f32
    rows = rows_ref[...]                                   # (TB, 1)
    tb = out_ref.shape[0]
    c_pad = table_ref.shape[0]
    nk = c_pad // k_block                                  # static

    def block_dot(base):
        cols = lax.broadcasted_iota(jnp.int32, (tb, k_block), 1) + base
        one_hot = (cols == rows).astype(table_ref.dtype)   # 0/1 exact in bf16 too
        return jnp.dot(one_hot, table_ref[pl.ds(base, k_block), :],
                       preferred_element_type=jnp.float32)

    # First K block initializes, remaining blocks accumulate. Each output row
    # receives exactly one nonzero product, so accumulating directly into
    # out_ref is exact regardless of its dtype.
    out_ref[...] = block_dot(0).astype(out_ref.dtype)
    if nk > 1:
        def body(kb, carry):
            base = pl.multiple_of(kb * k_block, k_block)
            out_ref[...] += block_dot(base).astype(out_ref.dtype)
            return carry
        lax.fori_loop(1, nk, body, 0)


def label_embedder_forward(table, rows, *, block_b=None, class_block=None,
                           compute_dtype=None,
                           max_table_vmem_bytes=40 * 1024 * 1024):
    """Embedding gather (rows already include the CFG drop). Returns (B, 1, hidden)."""
    B = rows.shape[0]
    n_rows, hidden = table.shape
    out_dtype = table.dtype

    tb_default, kb_default = _chip_defaults()
    block_b = tb_default if block_b is None else block_b
    k_block = kb_default if class_block is None else class_block

    if compute_dtype is not None:
        table = table.astype(compute_dtype)

    # ---- TPU-friendly padding ---------------------------------------------
    c_pad = _round_up(max(n_rows, k_block), k_block)   # one-hot lanes / MXU K dim
    h_pad = _round_up(hidden, 128)                     # table / output lane dim
    tb = _round_up(min(block_b, _round_up(B, 8)), 8)   # batch chunk (sublane mult of 8)
    b_pad = _round_up(B, tb)
    b_blocks = b_pad // tb

    table_vmem = c_pad * h_pad * jnp.dtype(table.dtype).itemsize
    if table_vmem > max_table_vmem_bytes:
        # Vocab-scale table: cannot stay VMEM-resident and a one-hot matmul
        # would be MXU/VMEM bound. XLA's gather is already HBM-roofline here.
        # TODO(synk): dedicated Pallas DMA row-gather kernel for vocab-scale tables.
        out = jnp.take(table, rows.astype(jnp.int32), axis=0,
                       mode="fill", fill_value=0)
        return out.astype(out_dtype)[:, None, :]

    # Split H over a second "parallel" grid axis only when there is a single
    # batch chunk, so v7x's second TensorCore still gets work; this also halves
    # the per-core resident table slab. Neutral on single-TC chips.
    th = h_pad // 2 if (b_blocks == 1 and h_pad % 256 == 0) else h_pad
    h_blocks = h_pad // th

    table_p = jnp.pad(table, ((0, c_pad - n_rows), (0, h_pad - hidden)))
    rows_p = jnp.pad(rows.astype(jnp.int32), (0, b_pad - B)).reshape(b_pad, 1)

    kernel = functools.partial(_embed_kernel, k_block=k_block)

    # VMEM budget: table (2x to also cover the double-buffered fallback) +
    # double-buffered rows/out blocks + live one-hot slab, with headroom.
    out_block_bytes = tb * th * jnp.dtype(out_dtype).itemsize
    rows_block_bytes = tb * 128 * 4          # lane-padded int32 block
    onehot_bytes = tb * k_block * 4
    vmem_limit = int(1.25 * (2 * table_vmem + 2 * out_block_bytes
                             + 2 * rows_block_bytes + 2 * onehot_bytes)) + (2 << 20)
    vmem_limit = min(max(vmem_limit, 4 << 20), 64 << 20)

    cost = pl.CostEstimate(
        flops=2 * b_pad * c_pad * h_pad,
        transcendentals=0,
        bytes_accessed=table_vmem + b_pad * 4
        + b_pad * h_pad * jnp.dtype(out_dtype).itemsize,
    )

    def build(table_spec):
        return pl.pallas_call(
            kernel,
            out_shape=jax.ShapeDtypeStruct((b_pad, h_pad), out_dtype),
            grid_spec=pltpu.PrefetchScalarGridSpec(
                num_scalar_prefetch=0,
                grid=(b_blocks, h_blocks),
                in_specs=[
                    pl.BlockSpec((tb, 1), lambda i, j: (i, 0)),   # rows chunk
                    table_spec,                                    # resident table slab
                ],
                out_specs=pl.BlockSpec((tb, th), lambda i, j: (i, j)),
            ),
            compiler_params=pltpu.CompilerParams(
                dimension_semantics=("parallel", "parallel"),
                vmem_limit_bytes=vmem_limit,
            ),
            cost_estimate=cost,
        )

    # The table block never changes along the batch axis: single-buffer it so
    # VMEM holds one copy instead of two. Fall back to default buffering if
    # this jax version rejects pipeline_mode on a pallas_call BlockSpec.
    try:
        table_spec = pl.BlockSpec((c_pad, th), lambda i, j: (0, j),
                                  pipeline_mode=pl.Buffered(1))
        out = build(table_spec)(rows_p, table_p)
    except Exception:  # pragma: no cover — older/stricter pipeline_mode handling
        table_spec = pl.BlockSpec((c_pad, th), lambda i, j: (0, j))
        out = build(table_spec)(rows_p, table_p)

    # Free layout plumbing in the wrapper: un-pad and unsqueeze(1).
    return out[:B, :hidden].astype(out_dtype).reshape(B, 1, hidden)


class LabelEmbedder:
    """JAX/Pallas port of the PyTorch LabelEmbedder (forward pass)."""

    def __init__(self, num_classes, hidden_size, dropout_prob, *, key):
        self.num_classes = num_classes
        self.hidden_size = hidden_size
        self.dropout_prob = dropout_prob
        use_cfg_embedding = 1 if dropout_prob > 0 else 0
        # nn.Embedding default init ~ N(0, 1); deterministic synthetic init.
        self.embedding_table = jax.random.normal(
            key, (num_classes + use_cfg_embedding, hidden_size), dtype=jnp.float32)

    def token_drop(self, labels, force_drop_ids=None, *, drop_key=None):
        if force_drop_ids is None:
            if drop_key is None:
                raise ValueError("drop_key is required for random label drop")
            drop = jax.random.uniform(drop_key, (labels.shape[0],)) < self.dropout_prob
        else:
            drop = force_drop_ids == 1
        # NOTE: if dropout_prob == 0 and a drop is forced, row `num_classes`
        # does not exist in the table; the kernel returns zeros for that row
        # (the PyTorch original would raise an out-of-range embedding error).
        return jnp.where(drop, self.num_classes, labels)

    def __call__(self, labels, train, force_drop_ids=None, *, drop_key=None,
                 compute_dtype=None):
        labels = jnp.asarray(labels, dtype=jnp.int32)
        use_dropout = self.dropout_prob > 0
        if (train and use_dropout) or (force_drop_ids is not None):
            labels = self.token_drop(labels, force_drop_ids, drop_key=drop_key)
        return label_embedder_forward(self.embedding_table, labels,
                                      compute_dtype=compute_dtype)


if __name__ == "__main__":
    num_classes = 10
    hidden_size = 32
    dropout_prob = 0.1
    batch = 8

    key = jax.random.PRNGKey(0)
    k_table, k_labels, k_drop = jax.random.split(key, 3)

    embedder = LabelEmbedder(num_classes, hidden_size, dropout_prob, key=k_table)
    labels = jax.random.randint(k_labels, (batch,), 0, num_classes, dtype=jnp.int32)

    # Deterministic force_drop_ids so the result is exactly checkable.
    force_drop_ids = jnp.array([0, 1, 0, 0, 1, 0, 0, 0], dtype=jnp.int32)

    out = jax.block_until_ready(
        embedder(labels, train=True, force_drop_ids=force_drop_ids))
    dropped = jnp.where(force_drop_ids == 1, num_classes, labels)
    ref = embedder.embedding_table[dropped][:, None, :]
    assert out.shape == (batch, 1, hidden_size), out.shape
    assert out.dtype == jnp.float32
    assert jnp.allclose(out, ref), "mismatch vs reference gather (forced drop)"

    # Train-time random drop path and eval (no-drop) path.
    out_train = jax.block_until_ready(embedder(labels, train=True, drop_key=k_drop))
    assert out_train.shape == (batch, 1, hidden_size)

    out_eval = jax.block_until_ready(embedder(labels, train=False))
    ref_eval = embedder.embedding_table[labels][:, None, :]
    assert jnp.allclose(out_eval, ref_eval), "mismatch vs reference gather (eval)"

    # Optional bf16 MXU path: row selection stays exact, values bf16-rounded.
    out_bf16 = jax.block_until_ready(
        embedder(labels, train=False, compute_dtype=jnp.bfloat16))
    ref_bf16 = embedder.embedding_table.astype(jnp.bfloat16).astype(
        jnp.float32)[labels][:, None, :]
    assert jnp.allclose(out_bf16, ref_bf16), "mismatch vs bf16 reference gather"

    # Larger internal check: exercises class/hidden/batch padding, the
    # K-blocked one-hot loop (c_pad > class_block) and the H-split grid axis.
    nc2, hid2, b2 = 300, 200, 40
    emb2 = LabelEmbedder(nc2, hid2, 0.1, key=jax.random.PRNGKey(1))
    lab2 = jax.random.randint(jax.random.PRNGKey(2), (b2,), 0, nc2, dtype=jnp.int32)
    out2 = jax.block_until_ready(emb2(lab2, train=False))
    ref2 = emb2.embedding_table[lab2][:, None, :]
    assert out2.shape == (b2, 1, hid2)
    assert jnp.allclose(out2, ref2), "mismatch vs reference gather (padded case)"

    print("KERNEL_OK")
</pallas_src>

<mosaic_0001>
module attributes {stable_mosaic.version = 11 : i64} {
  func.func @_embed_kernel(%arg0: i32, %arg1: i32, %arg2: memref<8x1xi32, #tpu.memory_space<vmem>>, %arg3: memref<256x128xf32, #tpu.memory_space<vmem>>, %arg4: memref<8x128xf32, #tpu.memory_space<vmem>>) attributes {dimension_semantics = [#tpu.dimension_semantics<parallel>, #tpu.dimension_semantics<parallel>], iteration_bounds = array<i64: 1, 1>, scalar_prefetch = 0 : i64, scratch_operands = 0 : i64, tpu.core_type = #tpu.core_type<tc>, window_params = [{transform_indices = @transform_0, window_bounds = array<i64: 8, 1>}, {pipeline_mode = #tpu.pipeline_mode<synchronous>, transform_indices = @transform_1, window_bounds = array<i64: 256, 128>}, {transform_indices = @transform_2, window_bounds = array<i64: 8, 128>}]} {
    %c0 = arith.constant 0 : index
    %c0_0 = arith.constant 0 : index
    %0 = vector.load %arg2[%c0, %c0_0] : memref<8x1xi32, #tpu.memory_space<vmem>>, vector<8x1xi32>
    %1 = tpu.iota {dimensions = array<i32: 1>} : vector<8x256xi32>
    %c0_i32 = arith.constant 0 : i32
    %2 = vector.broadcast %c0_i32 : i32 to vector<8x256xi32>
    %3 = arith.addi %1, %2 : vector<8x256xi32>
    %4 = vector.broadcast %0 : vector<8x1xi32> to vector<8x256xi32>
    %5 = arith.cmpi eq, %3, %4 : vector<8x256xi32>
    %6 = arith.extui %5 : vector<8x256xi1> to vector<8x256xi32>
    %7 = arith.sitofp %6 : vector<8x256xi32> to vector<8x256xf32>
    %c0_1 = arith.constant 0 : index
    %c0_2 = arith.constant 0 : index
    %8 = vector.load %arg3[%c0_1, %c0_2] : memref<256x128xf32, #tpu.memory_space<vmem>>, vector<256x128xf32>
    %cst = arith.constant dense<0.000000e+00> : vector<8x128xf32>
    %9 = tpu.matmul %7, %8, %cst {dimension_numbers = #tpu.dot_dimension_numbers<[1], [0], [0], [1], [0, 0, 1, 1], [], []>} : vector<8x256xf32>, vector<256x128xf32>, vector<8x128xf32> -> vector<8x128xf32>
    %c0_3 = arith.constant 0 : index
    %c0_4 = arith.constant 0 : index
    %10 = vector.load %arg4[%c0_3, %c0_4] : memref<8x128xf32, #tpu.memory_space<vmem>>, vector<8x128xf32>
    tpu.vector_store %arg4[%c0_3, %c0_4], %9 {strides = array<i32>} : memref<8x128xf32, #tpu.memory_space<vmem>>, vector<8x128xf32>,
    return
  }
  func.func @transform_0(%arg0: i32, %arg1: i32) -> (i32, i32) {
    %c0_i32 = arith.constant 0 : i32
    %c0_i32_0 = arith.constant 0 : i32
    return %arg0, %c0_i32 : i32, i32
  }
  func.func @transform_1(%arg0: i32, %arg1: i32) -> (i32, i32) {
    %c0_i32 = arith.constant 0 : i32
    %c0_i32_0 = arith.constant 0 : i32
    return %c0_i32, %arg1 : i32, i32
  }
  func.func @transform_2(%arg0: i32, %arg1: i32) -> (i32, i32) {
    %c0_i32 = arith.constant 0 : i32
    return %arg0, %arg1 : i32, i32
  }
}

module attributes {stable_mosaic.version = 11 : i64} {
  func.func @_embed_kernel(%arg0: i32, %arg1: i32, %arg2: memref<8x1xi32, #tpu.memory_space<vmem>>, %arg3: memref<256x128xf32, #tpu.memory_space<vmem>>, %arg4: memref<8x128xf32, #tpu.memory_space<vmem>>) attributes {dimension_semantics = [#tpu.dimension_semantics<parallel>, #tpu.dimension_semantics<parallel>], iteration_bounds = array<i64: 1, 1>, scalar_prefetch = 0 : i64, scratch_operands = 0 : i64, tpu.core_type = #tpu.core_type<tc>, window_params = [{transform_indices = @transform_0, window_bounds = array<i64: 8, 1>}, {transform_indices = @transform_1, window_bounds = array<i64: 256, 128>}, {transform_indices = @transform_2, window_bounds = array<i64: 8, 128>}]} {
    %c0 = arith.constant 0 : index
    %c0_0 = arith.constant 0 : index
    %0 = vector.load %arg2[%c0, %c0_0] : memref<8x1xi32, #tpu.memory_space<vmem>>, vector<8x1xi32>
    %1 = tpu.iota {dimensions = array<i32: 1>} : vector<8x256xi32>
    %c0_i32 = arith.constant 0 : i32
    %2 = vector.broadcast %c0_i32 : i32 to vector<8x256xi32>
    %3 = arith.addi %1, %2 : vector<8x256xi32>
    %4 = vector.broadcast %0 : vector<8x1xi32> to vector<8x256xi32>
    %5 = arith.cmpi eq, %3, %4 : vector<8x256xi32>
    %6 = arith.extui %5 : vector<8x256xi1> to vector<8x256xi32>
    %7 = arith.sitofp %6 : vector<8x256xi32> to vector<8x256xf32>
    %c0_1 = arith.constant 0 : index
    %c0_2 = arith.constant 0 : index
    %8 = vector.load %arg3[%c0_1, %c0_2] : memref<256x128xf32, #tpu.memory_space<vmem>>, vector<256x128xf32>
    %cst = arith.constant dense<0.000000e+00> : vector<8x128xf32>
    %9 = tpu.matmul %7, %8, %cst {dimension_numbers = #tpu.dot_dimension_numbers<[1], [0], [0], [1], [0, 0, 1, 1], [], []>} : vector<8x256xf32>, vector<256x128xf32>, vector<8x128xf32> -> vector<8x128xf32>
    %c0_3 = arith.constant 0 : index
    %c0_4 = arith.constant 0 : index
    %10 = vector.load %arg4[%c0_3, %c0_4] : memref<8x128xf32, #tpu.memory_space<vmem>>, vector<8x128xf32>
    tpu.vector_store %arg4[%c0_3, %c0_4], %9 {strides = array<i32>} : memref<8x128xf32, #tpu.memory_space<vmem>>, vector<8x128xf32>,
    return
  }
  func.func @transform_0(%arg0: i32, %arg1: i32) -> (i32, i32) {
    %c0_i32 = arith.constant 0 : i32
    %c0_i32_0 = arith.constant 0 : i32
    return %arg0, %c0_i32 : i32, i32
  }
  func.func @transform_1(%arg0: i32, %arg1: i32) -> (i32, i32) {
    %c0_i32 = arith.constant 0 : i32
    %c0_i32_0 = arith.constant 0 : i32
    return %c0_i32, %arg1 : i32, i32
  }
  func.func @transform_2(%arg0: i32, %arg1: i32) -> (i32, i32) {
    %c0_i32 = arith.constant 0 : i32
    return %arg0, %arg1 : i32, i32
  }
}

</mosaic_0001>

<bundles_post_ra>
// kernel: tpu_custom_call.1
= control target key start
LH: loop header
LB: loop body
LE: loop exit
PB: predicated region body
PF: predicated region fallthrough
CT: control target
= control target key end

     0   :  { %7 = vsyncpa [#allocation3], 0  ;;  %s277_s0 = inlined_call_operand.vmem [shape: s32[8,1], index: 0, kind: input, shape index: {}]   ;;  %s278_s1 = inlined_call_operand.hbm [shape: f32[256,128], index: 1, kind: input, shape index: {}]   ;;  %s279_s2 = inlined_call_operand.hbm [shape: f32[8,128], index: 2, kind: output, shape index: {}]  }
   0x1   :  { %8 = vsyncpa [#allocation4], 0  ;;  %s247_s9 = smov [#allocation2]  }
   0x2   :  { %s16_s10 = sshll.u32 %s247_s9, 4  ;;  %s17_s10 = int_to_ptr.vmem [resolvable:$true] %s16_s10 }
   0x3   :  { %s211_s11 = scalar_lea.vmem %s17_s10, 4096  ;;  %p216_p1 = scmp.lt.s32.totalorder %s17_s10, %s17_s10 }
   0x4   :  { %p212_p0 = scmp.ne.s32.totalorder %s17_s10, %s211_s11  ;;  %p217_p2 = scmp.lt.s32.totalorder %s211_s11, %s211_s11 }
   0x6   :  { %p218_p3 = por %p217_p2, %p216_p1 }
   0x8   :  { %p219_p4 = pnand %p218_p3, %p212_p0 }
   0xa   :  { %222 = shalt.err (!%p219_p4)
}
   0xb   :  { %s248_s12 = smov 128   ;;  %s249_s13 = smov 8  }
   0xc   :  { %22 = dma.hbm_to_vmem [thread:$0]  %s278_s1, 4096, %s17_s10, [#allocation3], %s248_s12, %s248_s12, %s249_s13  }
   0xd   :  { %243 = dma.done.wait [#allocation3], 4096  }
   0xe   :  { %244 = vsyncadd [#allocation3], 4294963200  ;;  %v250_v0 = vmov 0   ;;  %v26_v1 = vld [vmem:[%s277_s0] sm:$0xff]  ;;  %v70_v2 = vld [vmem:[#allocation2 + $0xf8] sm:$0xff]  ;;  %v27_v34 = vlaneseq  ;;  %v251_v38 = vmov 1.0  }
   0xf   :  { %202 = vset.pattern.permute.xlu0 %v250_v0  ;;  %v54_v3 = vld [vmem:[#allocation2 + $0x78] sm:$0xff]  ;;  %161 = vmatprep.subr.mxu0 %v70_v2  ;;  %v69_v4 = vld [vmem:[#allocation2 + $0xf0] sm:$0xff]  ;;  %v68_v6 = vld [vmem:[#allocation2 + $0xe8] sm:$0xff]  ;;  %s252_s0 = smov [#allocation5]  }
  0x10   :  { %31 = vperm.xlu0 %202, %v26_v1   ;;  %v53_v5 = vld [vmem:[#allocation2 + $0x70] sm:$0xff]  ;;  %162 = vmatpush3.msra.mxu0 %v54_v3  ;;  %v52_v7 = vld [vmem:[#allocation2 + $0x68] sm:$0xff]  ;;  %v67_v8 = vld [vmem:[#allocation2 + $0xe0] sm:$0xff]  ;;  %v28_v35 = vand.u32 127, %v27_v34  ;;  %s148_s1 = sshll.u32 %s252_s0, 4  ;;  %s149_s1 = int_to_ptr.vmem [resolvable:$true] %s148_s1 }
  0x11   :  { %163 = vmatprep.subr.mxu0 %v69_v4  ;;  %v51_v9 = vld [vmem:[#allocation2 + $0x60] sm:$0xff]  ;;  %v66_v10 = vld [vmem:[#allocation2 + $0xd8] sm:$0xff]  ;;  %v65_v12 = vld [vmem:[#allocation2 + $0xd0] sm:$0xff]  ;;  %s223_s18 = scalar_lea.vmem %s149_s1, 128  ;;  %p228_p6 = scmp.lt.s32.totalorder %s149_s1, %s149_s1 }
  0x12   :  { %164 = vmatpush3.msra.mxu0 %v53_v5  ;;  %v50_v11 = vld [vmem:[#allocation2 + $0x58] sm:$0xff]  ;;  %v49_v13 = vld [vmem:[#allocation2 + $0x50] sm:$0xff]  ;;  %v64_v14 = vld [vmem:[#allocation2 + $0xc8] sm:$0xff]  ;;  %v29_v36 = vadd.s32 128, %v28_v35  ;;  %p224_p5 = scmp.ne.s32.totalorder %s149_s1, %s223_s18  ;;  %p229_p7 = scmp.lt.s32.totalorder %s223_s18, %s223_s18 }
  0x13   :  { %165 = vmatprep.subr.mxu0 %v68_v6  ;;  %v48_v15 = vld [vmem:[#allocation2 + $0x48] sm:$0xff]  ;;  %v63_v16 = vld [vmem:[#allocation2 + $0xc0] sm:$0xff]  ;;  %v62_v18 = vld [vmem:[#allocation2 + $0xb8] sm:$0xff] }
  0x14   :  { %166 = vmatpush3.msra.mxu0 %v52_v7  ;;  %v47_v17 = vld [vmem:[#allocation2 + $0x40] sm:$0xff]  ;;  %v46_v19 = vld [vmem:[#allocation2 + $0x38] sm:$0xff]  ;;  %v61_v20 = vld [vmem:[#allocation2 + $0xb0] sm:$0xff]  ;;  %p230_p8 = por %p229_p7, %p228_p6 }
  0x15   :  { %167 = vmatprep.subr.mxu0 %v67_v8  ;;  %v45_v21 = vld [vmem:[#allocation2 + $0x30] sm:$0xff]  ;;  %v60_v22 = vld [vmem:[#allocation2 + $0xa8] sm:$0xff]  ;;  %v59_v24 = vld [vmem:[#allocation2 + $0xa0] sm:$0xff] }
  0x16   :  { %168 = vmatpush3.msra.mxu0 %v51_v9  ;;  %v44_v23 = vld [vmem:[#allocation2 + $0x28] sm:$0xff]  ;;  %v43_v25 = vld [vmem:[#allocation2 + $0x20] sm:$0xff]  ;;  %v58_v26 = vld [vmem:[#allocation2 + $0x98] sm:$0xff]  ;;  %p231_p9 = pnand %p230_p8, %p224_p5 }
  0x17   :  { %169 = vmatprep.subr.mxu0 %v66_v10  ;;  %v42_v27 = vld [vmem:[#allocation2 + $0x18] sm:$0xff]  ;;  %v57_v28 = vld [vmem:[#allocation2 + $0x90] sm:$0xff]  ;;  %v56_v30 = vld [vmem:[#allocation2 + $0x88] sm:$0xff] }
  0x18   :  { %170 = vmatpush3.msra.mxu0 %v50_v11  ;;  %v41_v29 = vld [vmem:[#allocation2 + $0x10] sm:$0xff]  ;;  %v40_v31 = vld [vmem:[#allocation2 + $0x8] sm:$0xff]  ;;  %v55_v32 = vld [vmem:[#allocation2 + $0x80] sm:$0xff] }
  0x19   :  { %171 = vmatprep.subr.mxu0 %v65_v12  ;;  %v39_v33 = vld [vmem:[#allocation2] sm:$0xff] }
  0x1a   :  { %172 = vmatpush3.msra.mxu0 %v49_v13 }
  0x1b   :  { %173 = vmatprep.subr.mxu0 %v64_v14 }
  0x1c   :  { %174 = vmatpush3.msra.mxu0 %v48_v15 }
  0x1d   :  { %175 = vmatprep.subr.mxu0 %v63_v16 }
  0x1e   :  { %176 = vmatpush3.msra.mxu0 %v47_v17 }
  0x1f   :  { %177 = vmatprep.subr.mxu0 %v62_v18 }
  0x20   :  { %178 = vmatpush3.msra.mxu0 %v46_v19 }
  0x21   :  { %179 = vmatprep.subr.mxu0 %v61_v20 }
  0x22   :  { %180 = vmatpush3.msra.mxu0 %v45_v21 }
  0x23   :  { %181 = vmatprep.subr.mxu0 %v60_v22 }
  0x24   :  { %182 = vmatpush3.msra.mxu0 %v44_v23 }
  0x25   :  { %183 = vmatprep.subr.mxu0 %v59_v24 }
  0x26   :  { %184 = vmatpush3.msra.mxu0 %v43_v25 }
  0x27   :  { %185 = vmatprep.subr.mxu0 %v58_v26 }
  0x28   :  { %186 = vmatpush3.msra.mxu0 %v42_v27 }
  0x29   :  { %187 = vmatprep.subr.mxu0 %v57_v28 }
  0x2a   :  { %188 = vmatpush3.msra.mxu0 %v41_v29 }
  0x2b   :  { %189 = vmatprep.subr.mxu0 %v56_v30 }
  0x2c   :  { %190 = vmatpush3.msra.mxu0 %v40_v31 }
  0x2d   :  { %191 = vmatprep.subr.mxu0 %v55_v32 }
  0x2e   :  { %192 = vmatpush3.msra.mxu0 %v39_v33 }
  0x8b   :  { %v32_v37 = vpop.permute.xlu0 %31 }
  0x8c   :  { %vm33_vm0 = vcmp.eq.s32.totalorder %v28_v35, %v32_v37  ;;  %vm34_vm1 = vcmp.eq.s32.totalorder %v29_v36, %v32_v37 }
  0x8d   :  { %159 = vmatprep.mubr.msk.f32.mxu0 %vm34_vm1, %v251_v38 }
  0x8e   :  { %160 = vmatmul.mubr.msk.f32.vlgmr.msra.gmra.mxu0 %vm33_vm0, %v251_v38 }
 0x14e   :  { %v193_v39 = vpop.f32.mrf.mxu0 }
 0x150   :  { %v194_v40 = vpop.f32.mrf.mxu0 }
 0x151   :  { %v195_v41 = vadd.f32 %v194_v40, %v193_v39 }
 0x153   :  { %141 = vst [vmem:[#allocation5] sm:$0xff] %v195_v41 }
 0x154   :  { %234 = shalt.err (!%p231_p9)
}
 0x155   :  { %151 = dma.vmem_to_hbm [thread:$0]  %s149_s1, 128, %s279_s2, [#allocation4]  }
 0x156   :  { %245 = dma.done.wait [#allocation4], 128  }
 0x157   :  { %246 = vsyncadd [#allocation4], 4294967168 }
 0x158   :  { %155 = vsyncpa [#allocation3], 1 }
 0x159   :  { %156 = vsyncpa [#allocation4], 1 }

// kernel: tpu_custom_call.1
= control target key start
LH: loop header
LB: loop body
LE: loop exit
PB: predicated region body
PF: predicated region fallthrough
CT: control target
= control target key end

     0   :  { %7 = vsyncpa [#allocation3], 0  ;;  %s277_s0 = inlined_call_operand.vmem [shape: s32[8,1], index: 0, kind: input, shape index: {}]   ;;  %s278_s1 = inlined_call_operand.hbm [shape: f32[256,128], index: 1, kind: input, shape index: {}]   ;;  %s279_s2 = inlined_call_operand.hbm [shape: f32[8,128], index: 2, kind: output, shape index: {}]  }
   0x1   :  { %8 = vsyncpa [#allocation4], 0  ;;  %s247_s9 = smov [#allocation2]  }
   0x2   :  { %s16_s10 = sshll.u32 %s247_s9, 4  ;;  %s17_s10 = int_to_ptr.vmem [resolvable:$true] %s16_s10 }
   0x3   :  { %s211_s11 = scalar_lea.vmem %s17_s10, 4096  ;;  %p216_p1 = scmp.lt.s32.totalorder %s17_s10, %s17_s10 }
   0x4   :  { %p212_p0 = scmp.ne.s32.totalorder %s17_s10, %s211_s11  ;;  %p217_p2 = scmp.lt.s32.totalorder %s211_s11, %s211_s11 }
   0x6   :  { %p218_p3 = por %p217_p2, %p216_p1 }
   0x8   :  { %p219_p4 = pnand %p218_p3, %p212_p0 }
   0xa   :  { %222 = shalt.err (!%p219_p4)
}
   0xb   :  { %s248_s12 = smov 128   ;;  %s249_s13 = smov 8  }
   0xc   :  { %22 = dma.hbm_to_vmem [thread:$0]  %s278_s1, 4096, %s17_s10, [#allocation3], %s248_s12, %s248_s12, %s249_s13  }
   0xd   :  { %243 = dma.done.wait [#allocation3], 4096  }
   0xe   :  { %244 = vsyncadd [#allocation3], 4294963200  ;;  %v250_v0 = vmov 0   ;;  %v26_v1 = vld [vmem:[%s277_s0] sm:$0xff]  ;;  %v70_v2 = vld [vmem:[#allocation2 + $0xf8] sm:$0xff]  ;;  %v27_v34 = vlaneseq  ;;  %v251_v38 = vmov 1.0  }
   0xf   :  { %202 = vset.pattern.permute.xlu0 %v250_v0  ;;  %v54_v3 = vld [vmem:[#allocation2 + $0x78] sm:$0xff]  ;;  %161 = vmatprep.subr.mxu0 %v70_v2  ;;  %v69_v4 = vld [vmem:[#allocation2 + $0xf0] sm:$0xff]  ;;  %v68_v6 = vld [vmem:[#allocation2 + $0xe8] sm:$0xff]  ;;  %s252_s0 = smov [#allocation5]  }
  0x10   :  { %31 = vperm.xlu0 %202, %v26_v1   ;;  %v53_v5 = vld [vmem:[#allocation2 + $0x70] sm:$0xff]  ;;  %162 = vmatpush3.msra.mxu0 %v54_v3  ;;  %v52_v7 = vld [vmem:[#allocation2 + $0x68] sm:$0xff]  ;;  %v67_v8 = vld [vmem:[#allocation2 + $0xe0] sm:$0xff]  ;;  %v28_v35 = vand.u32 127, %v27_v34  ;;  %s148_s1 = sshll.u32 %s252_s0, 4  ;;  %s149_s1 = int_to_ptr.vmem [resolvable:$true] %s148_s1 }
  0x11   :  { %163 = vmatprep.subr.mxu0 %v69_v4  ;;  %v51_v9 = vld [vmem:[#allocation2 + $0x60] sm:$0xff]  ;;  %v66_v10 = vld [vmem:[#allocation2 + $0xd8] sm:$0xff]  ;;  %v65_v12 = vld [vmem:[#allocation2 + $0xd0] sm:$0xff]  ;;  %s223_s18 = scalar_lea.vmem %s149_s1, 128  ;;  %p228_p6 = scmp.lt.s32.totalorder %s149_s1, %s149_s1 }
  0x12   :  { %164 = vmatpush3.msra.mxu0 %v53_v5  ;;  %v50_v11 = vld [vmem:[#allocation2 + $0x58] sm:$0xff]  ;;  %v49_v13 = vld [vmem:[#allocation2 + $0x50] sm:$0xff]  ;;  %v64_v14 = vld [vmem:[#allocation2 + $0xc8] sm:$0xff]  ;;  %v29_v36 = vadd.s32 128, %v28_v35  ;;  %p224_p5 = scmp.ne.s32.totalorder %s149_s1, %s223_s18  ;;  %p229_p7 = scmp.lt.s32.totalorder %s223_s18, %s223_s18 }
  0x13   :  { %165 = vmatprep.subr.mxu0 %v68_v6  ;;  %v48_v15 = vld [vmem:[#allocation2 + $0x48] sm:$0xff]  ;;  %v63_v16 = vld [vmem:[#allocation2 + $0xc0] sm:$0xff]  ;;  %v62_v18 = vld [vmem:[#allocation2 + $0xb8] sm:$0xff] }
  0x14   :  { %166 = vmatpush3.msra.mxu0 %v52_v7  ;;  %v47_v17 = vld [vmem:[#allocation2 + $0x40] sm:$0xff]  ;;  %v46_v19 = vld [vmem:[#allocation2 + $0x38] sm:$0xff]  ;;  %v61_v20 = vld [vmem:[#allocation2 + $0xb0] sm:$0xff]  ;;  %p230_p8 = por %p229_p7, %p228_p6 }
  0x15   :  { %167 = vmatprep.subr.mxu0 %v67_v8  ;;  %v45_v21 = vld [vmem:[#allocation2 + $0x30] sm:$0xff]  ;;  %v60_v22 = vld [vmem:[#allocation2 + $0xa8] sm:$0xff]  ;;  %v59_v24 = vld [vmem:[#allocation2 + $0xa0] sm:$0xff] }
  0x16   :  { %168 = vmatpush3.msra.mxu0 %v51_v9  ;;  %v44_v23 = vld [vmem:[#allocation2 + $0x28] sm:$0xff]  ;;  %v43_v25 = vld [vmem:[#allocation2 + $0x20] sm:$0xff]  ;;  %v58_v26 = vld [vmem:[#allocation2 + $0x98] sm:$0xff]  ;;  %p231_p9 = pnand %p230_p8, %p224_p5 }
  0x17   :  { %169 = vmatprep.subr.mxu0 %v66_v10  ;;  %v42_v27 = vld [vmem:[#allocation2 + $0x18] sm:$0xff]  ;;  %v57_v28 = vld [vmem:[#allocation2 + $0x90] sm:$0xff]  ;;  %v56_v30 = vld [vmem:[#allocation2 + $0x88] sm:$0xff] }
  0x18   :  { %170 = vmatpush3.msra.mxu0 %v50_v11  ;;  %v41_v29 = vld [vmem:[#allocation2 + $0x10] sm:$0xff]  ;;  %v40_v31 = vld [vmem:[#allocation2 + $0x8] sm:$0xff]  ;;  %v55_v32 = vld [vmem:[#allocation2 + $0x80] sm:$0xff] }
  0x19   :  { %171 = vmatprep.subr.mxu0 %v65_v12  ;;  %v39_v33 = vld [vmem:[#allocation2] sm:$0xff] }
  0x1a   :  { %172 = vmatpush3.msra.mxu0 %v49_v13 }
  0x1b   :  { %173 = vmatprep.subr.mxu0 %v64_v14 }
  0x1c   :  { %174 = vmatpush3.msra.mxu0 %v48_v15 }
  0x1d   :  { %175 = vmatprep.subr.mxu0 %v63_v16 }
  0x1e   :  { %176 = vmatpush3.msra.mxu0 %v47_v17 }
  0x1f   :  { %177 = vmatprep.subr.mxu0 %v62_v18 }
  0x20   :  { %178 = vmatpush3.msra.mxu0 %v46_v19 }
  0x21   :  { %179 = vmatprep.subr.mxu0 %v61_v20 }
  0x22   :  { %180 = vmatpush3.msra.mxu0 %v45_v21 }
  0x23   :  { %181 = vmatprep.subr.mxu0 %v60_v22 }
  0x24   :  { %182 = vmatpush3.msra.mxu0 %v44_v23 }
  0x25   :  { %183 = vmatprep.subr.mxu0 %v59_v24 }
  0x26   :  { %184 = vmatpush3.msra.mxu0 %v43_v25 }
  0x27   :  { %185 = vmatprep.subr.mxu0 %v58_v26 }
  0x28   :  { %186 = vmatpush3.msra.mxu0 %v42_v27 }
  0x29   :  { %187 = vmatprep.subr.mxu0 %v57_v28 }
  0x2a   :  { %188 = vmatpush3.msra.mxu0 %v41_v29 }
  0x2b   :  { %189 = vmatprep.subr.mxu0 %v56_v30 }
  0x2c   :  { %190 = vmatpush3.msra.mxu0 %v40_v31 }
  0x2d   :  { %191 = vmatprep.subr.mxu0 %v55_v32 }
  0x2e   :  { %192 = vmatpush3.msra.mxu0 %v39_v33 }
  0x8b   :  { %v32_v37 = vpop.permute.xlu0 %31 }
  0x8c   :  { %vm33_vm0 = vcmp.eq.s32.totalorder %v28_v35, %v32_v37  ;;  %vm34_vm1 = vcmp.eq.s32.totalorder %v29_v36, %v32_v37 }
  0x8d   :  { %159 = vmatprep.mubr.msk.f32.mxu0 %vm34_vm1, %v251_v38 }
  0x8e   :  { %160 = vmatmul.mubr.msk.f32.vlgmr.msra.gmra.mxu0 %vm33_vm0, %v251_v38 }
 0x14e   :  { %v193_v39 = vpop.f32.mrf.mxu0 }
 0x150   :  { %v194_v40 = vpop.f32.mrf.mxu0 }
 0x151   :  { %v195_v41 = vadd.f32 %v194_v40, %v193_v39 }
 0x153   :  { %141 = vst [vmem:[#allocation5] sm:$0xff] %v195_v41 }
 0x154   :  { %234 = shalt.err (!%p231_p9)
}
 0x155   :  { %151 = dma.vmem_to_hbm [thread:$0]  %s149_s1, 128, %s279_s2, [#allocation4]  }
 0x156   :  { %245 = dma.done.wait [#allocation4], 128  }
 0x157   :  { %246 = vsyncadd [#allocation4], 4294967168 }
 0x158   :  { %155 = vsyncpa [#allocation3], 1 }
 0x159   :  { %156 = vsyncpa [#allocation4], 1 }

</bundles_post_ra>
